<compile_context>
chip_gen: v7x
topology: tpu7x:2x2x1
jax: 0.10.0
libtpu: 0.0.40
codegen_flags: <defaults>
</compile_context>

<pallas_src>
import functools

import jax
import jax.numpy as jnp
from jax.experimental import pallas as pl
from jax.experimental.pallas import tpu as pltpu


def _round_up(x, m):
    return (x + m - 1) // m * m


def _mlp_kernel(x_ref,
                w1_ref, b1_ref,
                w2_ref, b2_ref,
                w3_ref, b3_ref,
                w4_ref, b4_ref,
                out_ref):
    """Whole forward pass for one batch tile; all weights resident in VMEM."""
    # Single intentional cast to bf16 for the MXU (weights are already bf16).
    x = x_ref[...].astype(jnp.bfloat16)

    # Layer 1: (TB, S) @ (S, 512) + (1, 512) -> ReLU   (f32 accumulation)
    h1 = jnp.dot(x, w1_ref[...], preferred_element_type=jnp.float32)
    h1 = jnp.maximum(h1 + b1_ref[...], 0.0)

    # Layer 2: (TB, 512) @ (512, 256) + (1, 256) -> ReLU
    h2 = jnp.dot(h1.astype(jnp.bfloat16), w2_ref[...],
                 preferred_element_type=jnp.float32)
    h2 = jnp.maximum(h2 + b2_ref[...], 0.0)

    # Dropout(0.3) is identity in eval mode (inference forward pass).
    # TODO(synk): training-mode dropout (pltpu.prng_random_bits mask) not emitted.

    # Layer 3: (TB, 256) @ (256, 128) + (1, 128) -> ReLU
    h3 = jnp.dot(h2.astype(jnp.bfloat16), w3_ref[...],
                 preferred_element_type=jnp.float32)
    h3 = jnp.maximum(h3 + b3_ref[...], 0.0)

    # Layer 4 (lane-padded): (TB, 128) @ (128, A_pad) + (1, A_pad), no activation.
    out = jnp.dot(h3.astype(jnp.bfloat16), w4_ref[...],
                  preferred_element_type=jnp.float32)
    out_ref[...] = (out + b4_ref[...]).astype(out_ref.dtype)


@functools.partial(jax.jit, static_argnames=("batch_tile",))
def nn_forward(x, params, *, batch_tile=256):
    """Pallas forward for the NN module. x: (B, state_dim) float32."""
    (w1, b1), (w2, b2), (w3, b3), (w4, b4) = params
    B, S = x.shape
    A = w4.shape[1]

    # Effective batch tile: whole batch in one step when small, else batch_tile.
    tile = min(batch_tile, _round_up(B, 8))
    tile = _round_up(tile, 8)
    B_pad = _round_up(B, tile)
    A_pad = _round_up(A, 128)          # lane-dense final layer / output store

    if B_pad != B:
        x = jnp.pad(x, ((0, B_pad - B), (0, 0)))
    if A_pad != A:
        w4 = jnp.pad(w4, ((0, 0), (0, A_pad - A)))
        b4 = jnp.pad(b4, ((0, 0), (0, A_pad - A)))

    # Weights/biases: whole arrays, single resident copy in VMEM (no re-DMA,
    # no double-buffering across batch-grid steps).
    vmem_spec = pl.BlockSpec(memory_space=pltpu.MemorySpace.VMEM)

    out = pl.pallas_call(
        _mlp_kernel,
        out_shape=jax.ShapeDtypeStruct((B_pad, A_pad), jnp.float32),
        grid_spec=pltpu.PrefetchScalarGridSpec(
            num_scalar_prefetch=0,
            grid=(B_pad // tile,),
            in_specs=[
                pl.BlockSpec((tile, S), lambda i: (i, 0)),  # x batch tile
                vmem_spec, vmem_spec,                        # w1, b1
                vmem_spec, vmem_spec,                        # w2, b2
                vmem_spec, vmem_spec,                        # w3, b3
                vmem_spec, vmem_spec,                        # w4, b4 (padded)
            ],
            out_specs=pl.BlockSpec((tile, A_pad), lambda i: (i, 0)),
        ),
        compiler_params=pltpu.CompilerParams(
            dimension_semantics=("parallel",),
        ),
    )(x, w1, b1, w2, b2, w3, b3, w4, b4)

    return out[:B, :A]


def init_params(key, state_dim, action_dim):
    """Deterministic init matching NN._init_weights:
       weights ~ N(0, 0.01) stored transposed (in, out) in bf16,
       biases ~ U(-0.1, 0.1) in f32, shape (1, out)."""
    dims = [(state_dim, 512), (512, 256), (256, 128), (128, action_dim)]
    params = []
    for (din, dout) in dims:
        key, kw, kb = jax.random.split(key, 3)
        w = (0.01 * jax.random.normal(kw, (din, dout), dtype=jnp.float32)
             ).astype(jnp.bfloat16)
        b = jax.random.uniform(kb, (1, dout), dtype=jnp.float32,
                               minval=-0.1, maxval=0.1)
        params.append((w, b))
    return params


def _ref_forward(x, params):
    """Pure-JAX reference with the same numerics (bf16 inputs, f32 accumulation)."""
    h = x
    for i, (w, b) in enumerate(params):
        h = jnp.dot(h.astype(jnp.bfloat16), w,
                    preferred_element_type=jnp.float32) + b
        if i < 3:
            h = jnp.maximum(h, 0.0)
    return h


if __name__ == "__main__":
    state_dim = 32     # small state_dim
    action_dim = 8     # small action_dim
    batch = 64

    key = jax.random.PRNGKey(0)
    key, kx = jax.random.split(key)
    x = jax.random.normal(kx, (batch, state_dim), dtype=jnp.float32)
    params = init_params(key, state_dim, action_dim)

    ref = _ref_forward(x, params)

    # 1) Default path: whole batch in a single fat tile (grid of 1).
    out = nn_forward(x, params)
    jax.block_until_ready(out)
    assert out.shape == (batch, action_dim)
    assert jnp.allclose(out, ref, atol=1e-3, rtol=1e-2)

    # 2) Multi-step grid path (B > batch_tile) exercising the batch pipeline.
    out_tiled = nn_forward(x, params, batch_tile=16)
    jax.block_until_ready(out_tiled)
    assert jnp.allclose(out_tiled, ref, atol=1e-3, rtol=1e-2)

    # 3) Batch not a multiple of the tile (exercises batch zero-padding).
    out_odd = nn_forward(x[:50], params, batch_tile=16)
    jax.block_until_ready(out_odd)
    assert out_odd.shape == (50, action_dim)
    assert jnp.allclose(out_odd, ref[:50], atol=1e-3, rtol=1e-2)

    print("KERNEL_OK")
</pallas_src>

<mosaic_0001>
module attributes {stable_mosaic.version = 11 : i64} {
  func.func @_mlp_kernel(%arg0: i32, %arg1: memref<64x32xf32, #tpu.memory_space<vmem>>, %arg2: memref<32x512xbf16, #tpu.memory_space<vmem>>, %arg3: memref<1x512xf32, #tpu.memory_space<vmem>>, %arg4: memref<512x256xbf16, #tpu.memory_space<vmem>>, %arg5: memref<1x256xf32, #tpu.memory_space<vmem>>, %arg6: memref<256x128xbf16, #tpu.memory_space<vmem>>, %arg7: memref<1x128xf32, #tpu.memory_space<vmem>>, %arg8: memref<128x128xbf16, #tpu.memory_space<vmem>>, %arg9: memref<1x128xf32, #tpu.memory_space<vmem>>, %arg10: memref<64x128xf32, #tpu.memory_space<vmem>>) attributes {dimension_semantics = [#tpu.dimension_semantics<parallel>], iteration_bounds = array<i64: 1>, scalar_prefetch = 0 : i64, scratch_operands = 0 : i64, tpu.core_type = #tpu.core_type<tc>, window_params = [{transform_indices = @transform_0, window_bounds = array<i64: 64, 32>}, {pipeline_mode = #tpu.pipeline_mode<synchronous>, transform_indices = @transform_1, window_bounds = array<i64: 32, 512>}, {pipeline_mode = #tpu.pipeline_mode<synchronous>, transform_indices = @transform_2, window_bounds = array<i64: 1, 512>}, {pipeline_mode = #tpu.pipeline_mode<synchronous>, transform_indices = @transform_3, window_bounds = array<i64: 512, 256>}, {pipeline_mode = #tpu.pipeline_mode<synchronous>, transform_indices = @transform_4, window_bounds = array<i64: 1, 256>}, {pipeline_mode = #tpu.pipeline_mode<synchronous>, transform_indices = @transform_5, window_bounds = array<i64: 256, 128>}, {pipeline_mode = #tpu.pipeline_mode<synchronous>, transform_indices = @transform_6, window_bounds = array<i64: 1, 128>}, {pipeline_mode = #tpu.pipeline_mode<synchronous>, transform_indices = @transform_7, window_bounds = array<i64: 128, 128>}, {pipeline_mode = #tpu.pipeline_mode<synchronous>, transform_indices = @transform_8, window_bounds = array<i64: 1, 128>}, {transform_indices = @transform_9, window_bounds = array<i64: 64, 128>}]} {
    %c0 = arith.constant 0 : index
    %c0_0 = arith.constant 0 : index
    %0 = vector.load %arg1[%c0, %c0_0] : memref<64x32xf32, #tpu.memory_space<vmem>>, vector<64x32xf32>
    %1 = arith.truncf %0 : vector<64x32xf32> to vector<64x32xbf16>
    %c0_1 = arith.constant 0 : index
    %c0_2 = arith.constant 0 : index
    %2 = vector.load %arg2[%c0_1, %c0_2] : memref<32x512xbf16, #tpu.memory_space<vmem>>, vector<32x512xbf16>
    %cst = arith.constant dense<0.000000e+00> : vector<64x512xf32>
    %3 = tpu.matmul %1, %2, %cst {dimension_numbers = #tpu.dot_dimension_numbers<[1], [0], [0], [1], [0, 0, 1, 1], [], []>} : vector<64x32xbf16>, vector<32x512xbf16>, vector<64x512xf32> -> vector<64x512xf32>
    %c0_3 = arith.constant 0 : index
    %c0_4 = arith.constant 0 : index
    %4 = vector.load %arg3[%c0_3, %c0_4] : memref<1x512xf32, #tpu.memory_space<vmem>>, vector<1x512xf32>
    %5 = vector.broadcast %4 : vector<1x512xf32> to vector<64x512xf32>
    %6 = arith.addf %3, %5 : vector<64x512xf32>
    %cst_5 = arith.constant 0.000000e+00 : f32
    %7 = vector.broadcast %cst_5 : f32 to vector<64x512xf32>
    %8 = arith.maximumf %6, %7 : vector<64x512xf32>
    %9 = arith.truncf %8 : vector<64x512xf32> to vector<64x512xbf16>
    %c0_6 = arith.constant 0 : index
    %c0_7 = arith.constant 0 : index
    %10 = vector.load %arg4[%c0_6, %c0_7] : memref<512x256xbf16, #tpu.memory_space<vmem>>, vector<512x256xbf16>
    %cst_8 = arith.constant dense<0.000000e+00> : vector<64x256xf32>
    %11 = tpu.matmul %9, %10, %cst_8 {dimension_numbers = #tpu.dot_dimension_numbers<[1], [0], [0], [1], [0, 0, 1, 1], [], []>} : vector<64x512xbf16>, vector<512x256xbf16>, vector<64x256xf32> -> vector<64x256xf32>
    %c0_9 = arith.constant 0 : index
    %c0_10 = arith.constant 0 : index
    %12 = vector.load %arg5[%c0_9, %c0_10] : memref<1x256xf32, #tpu.memory_space<vmem>>, vector<1x256xf32>
    %13 = vector.broadcast %12 : vector<1x256xf32> to vector<64x256xf32>
    %14 = arith.addf %11, %13 : vector<64x256xf32>
    %cst_11 = arith.constant 0.000000e+00 : f32
    %15 = vector.broadcast %cst_11 : f32 to vector<64x256xf32>
    %16 = arith.maximumf %14, %15 : vector<64x256xf32>
    %17 = arith.truncf %16 : vector<64x256xf32> to vector<64x256xbf16>
    %c0_12 = arith.constant 0 : index
    %c0_13 = arith.constant 0 : index
    %18 = vector.load %arg6[%c0_12, %c0_13] : memref<256x128xbf16, #tpu.memory_space<vmem>>, vector<256x128xbf16>
    %cst_14 = arith.constant dense<0.000000e+00> : vector<64x128xf32>
    %19 = tpu.matmul %17, %18, %cst_14 {dimension_numbers = #tpu.dot_dimension_numbers<[1], [0], [0], [1], [0, 0, 1, 1], [], []>} : vector<64x256xbf16>, vector<256x128xbf16>, vector<64x128xf32> -> vector<64x128xf32>
    %c0_15 = arith.constant 0 : index
    %c0_16 = arith.constant 0 : index
    %20 = vector.load %arg7[%c0_15, %c0_16] : memref<1x128xf32, #tpu.memory_space<vmem>>, vector<1x128xf32>
    %21 = vector.broadcast %20 : vector<1x128xf32> to vector<64x128xf32>
    %22 = arith.addf %19, %21 : vector<64x128xf32>
    %cst_17 = arith.constant 0.000000e+00 : f32
    %23 = vector.broadcast %cst_17 : f32 to vector<64x128xf32>
    %24 = arith.maximumf %22, %23 : vector<64x128xf32>
    %25 = arith.truncf %24 : vector<64x128xf32> to vector<64x128xbf16>
    %c0_18 = arith.constant 0 : index
    %c0_19 = arith.constant 0 : index
    %26 = vector.load %arg8[%c0_18, %c0_19] : memref<128x128xbf16, #tpu.memory_space<vmem>>, vector<128x128xbf16>
    %cst_20 = arith.constant dense<0.000000e+00> : vector<64x128xf32>
    %27 = tpu.matmul %25, %26, %cst_20 {dimension_numbers = #tpu.dot_dimension_numbers<[1], [0], [0], [1], [0, 0, 1, 1], [], []>} : vector<64x128xbf16>, vector<128x128xbf16>, vector<64x128xf32> -> vector<64x128xf32>
    %c0_21 = arith.constant 0 : index
    %c0_22 = arith.constant 0 : index
    %28 = vector.load %arg9[%c0_21, %c0_22] : memref<1x128xf32, #tpu.memory_space<vmem>>, vector<1x128xf32>
    %29 = vector.broadcast %28 : vector<1x128xf32> to vector<64x128xf32>
    %30 = arith.addf %27, %29 : vector<64x128xf32>
    %c0_23 = arith.constant 0 : index
    %c0_24 = arith.constant 0 : index
    %31 = vector.load %arg10[%c0_23, %c0_24] : memref<64x128xf32, #tpu.memory_space<vmem>>, vector<64x128xf32>
    tpu.vector_store %arg10[%c0_23, %c0_24], %30 {strides = array<i32>} : memref<64x128xf32, #tpu.memory_space<vmem>>, vector<64x128xf32>,
    return
  }
  func.func @transform_0(%arg0: i32) -> (i32, i32) {
    %c0_i32 = arith.constant 0 : i32
    %c0_i32_0 = arith.constant 0 : i32
    return %arg0, %c0_i32 : i32, i32
  }
  func.func @transform_1(%arg0: i32) -> (i32, i32) {
    %c0_i32 = arith.constant 0 : i32
    %c0_i32_0 = arith.constant 0 : i32
    %c0_i32_1 = arith.constant 0 : i32
    return %c0_i32, %c0_i32_0 : i32, i32
  }
  func.func @transform_2(%arg0: i32) -> (i32, i32) {
    %c0_i32 = arith.constant 0 : i32
    %c0_i32_0 = arith.constant 0 : i32
    %c0_i32_1 = arith.constant 0 : i32
    return %c0_i32, %c0_i32_0 : i32, i32
  }
  func.func @transform_3(%arg0: i32) -> (i32, i32) {
    %c0_i32 = arith.constant 0 : i32
    %c0_i32_0 = arith.constant 0 : i32
    %c0_i32_1 = arith.constant 0 : i32
    return %c0_i32, %c0_i32_0 : i32, i32
  }
  func.func @transform_4(%arg0: i32) -> (i32, i32) {
    %c0_i32 = arith.constant 0 : i32
    %c0_i32_0 = arith.constant 0 : i32
    %c0_i32_1 = arith.constant 0 : i32
    return %c0_i32, %c0_i32_0 : i32, i32
  }
  func.func @transform_5(%arg0: i32) -> (i32, i32) {
    %c0_i32 = arith.constant 0 : i32
    %c0_i32_0 = arith.constant 0 : i32
    %c0_i32_1 = arith.constant 0 : i32
    return %c0_i32, %c0_i32_0 : i32, i32
  }
  func.func @transform_6(%arg0: i32) -> (i32, i32) {
    %c0_i32 = arith.constant 0 : i32
    %c0_i32_0 = arith.constant 0 : i32
    %c0_i32_1 = arith.constant 0 : i32
    return %c0_i32, %c0_i32_0 : i32, i32
  }
  func.func @transform_7(%arg0: i32) -> (i32, i32) {
    %c0_i32 = arith.constant 0 : i32
    %c0_i32_0 = arith.constant 0 : i32
    %c0_i32_1 = arith.constant 0 : i32
    return %c0_i32, %c0_i32_0 : i32, i32
  }
  func.func @transform_8(%arg0: i32) -> (i32, i32) {
    %c0_i32 = arith.constant 0 : i32
    %c0_i32_0 = arith.constant 0 : i32
    %c0_i32_1 = arith.constant 0 : i32
    return %c0_i32, %c0_i32_0 : i32, i32
  }
  func.func @transform_9(%arg0: i32) -> (i32, i32) {
    %c0_i32 = arith.constant 0 : i32
    %c0_i32_0 = arith.constant 0 : i32
    return %arg0, %c0_i32 : i32, i32
  }
}

</mosaic_0001>

<bundles_post_ra>
// kernel: nn_forward.1
= control target key start
LH: loop header
LB: loop body
LE: loop exit
PB: predicated region body
PF: predicated region fallthrough
CT: control target
= control target key end

     0   :  { %14 = vsyncpa [#allocation3], 0  ;;  %s1637_s30 = smov [#allocation2]   ;;  %s1949_s0 = inlined_call_operand.vmem [shape: f32[64,32], index: 0, kind: input, shape index: {}]   ;;  %s1950_s1 = inlined_call_operand.vmem [shape: bf16[32,512], index: 1, kind: input, shape index: {}]   ;;  %s1951_s2 = inlined_call_operand.vmem [shape: f32[1,512], index: 2, kind: input, shape index: {}]   ;;  %s1952_s3 = inlined_call_operand.hbm [shape: bf16[512,256], index: 3, kind: input, shape index: {}]   ;;  %s1953_s4 = inlined_call_operand.vmem [shape: f32[1,256], index: 4, kind: input, shape index: {}]   ;;  %s1954_s5 = inlined_call_operand.vmem [shape: bf16[256,128], index: 5, kind: input, shape index: {}]   ;;  %s1955_s6 = inlined_call_operand.vmem [shape: f32[1,128], index: 6, kind: input, shape index: {}]   ;;  %s1956_s7 = inlined_call_operand.vmem [shape: bf16[128,128], index: 7, kind: input, shape index: {}]   ;;  %s1957_s8 = inlined_call_operand.vmem [shape: f32[1,128], index: 8, kind: input, shape index: {}]   ;;  %s1958_s9 = inlined_call_operand.vmem [shape: f32[64,128], index: 9, kind: output, shape index: {}]  }
   0x1   :  { %s26_s10 = sshll.u32 %s1637_s30, 4  ;;  %s1613_s13 = scalar_lea.hbm %s1952_s3, 8192  ;;  %s27_s10 = int_to_ptr.vmem [resolvable:$true] %s26_s10 }
   0x2   :  { %p1614_p0 = scmp.ne.s32.totalorder %s1952_s3, %s1613_s13  ;;  %p1617_p1 = scmp.lt.u32.totalorder %s1613_s13, %s1952_s3 }
   0x4   :  { %p1619_p2 = pnand %p1617_p1, %p1614_p0 }
   0x6   :  { %1622 = shalt.err (!%p1619_p2)
}
   0x7   :  { %s1623_s18 = scalar_lea.vmem %s27_s10, 8192  ;;  %p1628_p4 = scmp.lt.s32.totalorder %s27_s10, %s27_s10 }
   0x8   :  { %p1624_p3 = scmp.ne.s32.totalorder %s27_s10, %s1623_s18  ;;  %p1629_p5 = scmp.lt.s32.totalorder %s1623_s18, %s1623_s18 }
   0xa   :  { %p1630_p6 = por %p1629_p5, %p1628_p4 }
   0xc   :  { %p1631_p7 = pnand %p1630_p6, %p1624_p3 }
   0xe   :  { %1634 = shalt.err (!%p1631_p7)
}
   0xf   :  { %s1638_s19 = smov 128   ;;  %s1639_s20 = smov 8  }
  0x10   :  { %32 = dma.hbm_to_vmem [thread:$0]  %s1952_s3, 8192, %s27_s10, [#allocation3], %s1638_s19, %s1638_s19, %s1639_s20  }
  0x11   :  { %1635 = dma.done.wait [#allocation3], 8192  }
  0x12   :  { %1636 = vsyncadd [#allocation3], 4294959104  ;;  %v1640_v0 = vmov 0   ;;  %v1481_v1 = vld [vmem:[%s1950_s1 + $0x4] ss:$16 sps:$4 sm:$0xff]   ;;  %v48_v10 = vld [vmem:[%s1949_s0 + $0x8] sm:$0xff] }
  0x13   :  { %174 = vmatprep.mubr.bf16.mxu0 %v1640_v0  ;;  %247 = vmatprep.mubr.bf16.mxu1 %v1640_v0  ;;  %v1483_v2 = vld [vmem:[%s1950_s1 + $0xc] ss:$16 sps:$4 sm:$0xff]   ;;  %v1485_v3 = vld [vmem:[%s1950_s1] ss:$16 sps:$4 sm:$0xff]   ;;  %v1486_v4 = vld [vmem:[%s1950_s1 + $0x8] ss:$16 sps:$4 sm:$0xff]  }
  0x14   :  { %142 = vmatprep.subr.bf16.mxu0 %v1481_v1  ;;  %215 = vmatprep.subr.bf16.mxu1 %v1483_v2  ;;  %v1487_v5 = vld [vmem:[%s1950_s1 + $0x24] ss:$16 sps:$4 sm:$0xff]   ;;  %v1489_v6 = vld [vmem:[%s1950_s1 + $0x2c] ss:$16 sps:$4 sm:$0xff]   ;;  %v1491_v7 = vld [vmem:[%s1950_s1 + $0x20] ss:$16 sps:$4 sm:$0xff]  }
  0x15   :  { %143 = vmatpush1.bf16.msra.mxu0 %v1485_v3  ;;  %216 = vmatpush1.bf16.msra.mxu1 %v1486_v4  ;;  %v1492_v8 = vld [vmem:[%s1950_s1 + $0x28] ss:$16 sps:$4 sm:$0xff]   ;;  %v47_v9 = vld [vmem:[%s1949_s0] sm:$0xff]  ;;  %vm129_vm0 = vcmask 261120   ;;  %v49_v16 = vld [vmem:[%s1949_s0 + $0x10] sm:$0xff] }
  0x16   :  { %144 = vmatprep.subr.bf16.mxu0 %v1487_v5  ;;  %217 = vmatprep.subr.bf16.mxu1 %v1489_v6  ;;  %v55_v11 = vpack.c.bf16 %v48_v10, %v47_v9  ;;  %v1493_v12 = vld [vmem:[#allocation2] ss:$8 sps:$4 sm:$0xff]   ;;  %v1495_v13 = vld [vmem:[#allocation2 + $0x4] ss:$8 sps:$4 sm:$0xff]   ;;  %v1501_v17 = vld [vmem:[#allocation2 + $0x14] ss:$8 sps:$4 sm:$0xff]  }
  0x17   :  { %v1496_v14 = vld [vmem:[#allocation2 + $0x100] ss:$8 sps:$4 sm:$0xff]   ;;  %v1498_v15 = vld [vmem:[#allocation2 + $0x104] ss:$8 sps:$4 sm:$0xff]   ;;  %v50_v18 = vld [vmem:[%s1949_s0 + $0x18] sm:$0xff] }
  0x18   :  { %v1504_v19 = vld [vmem:[#allocation2 + $0x114] ss:$8 sps:$4 sm:$0xff]   ;;  %v1499_v20 = vld [vmem:[#allocation2 + $0x10] ss:$8 sps:$4 sm:$0xff]   ;;  %v56_v22 = vpack.c.bf16 %v50_v18, %v49_v16  ;;  %v1507_v23 = vld [vmem:[#allocation2 + $0x24] ss:$8 sps:$4 sm:$0xff]  }
  0x19   :  { %145 = vmatpush1.bf16.msra.mxu0 %v1491_v7  ;;  %218 = vmatpush1.bf16.msra.mxu1 %v1492_v8  ;;  %v1502_v21 = vld [vmem:[#allocation2 + $0x110] ss:$8 sps:$4 sm:$0xff]   ;;  %v1510_v24 = vld [vmem:[#allocation2 + $0x124] ss:$8 sps:$4 sm:$0xff]   ;;  %v1505_v26 = vld [vmem:[#allocation2 + $0x20] ss:$8 sps:$4 sm:$0xff]  }
  0x1a   :  { %732 = vmatprep.subr.bf16.mxu1 %v1495_v13  ;;  %805 = vmatprep.subr.bf16.mxu0 %v1498_v15  ;;  %v51_v25 = vld [vmem:[%s1949_s0 + $0x20] sm:$0xff]  ;;  %v1513_v28 = vld [vmem:[#allocation2 + $0x34] ss:$8 sps:$4 sm:$0xff]   ;;  %v52_v30 = vld [vmem:[%s1949_s0 + $0x28] sm:$0xff] }
  0x1b   :  { %v1508_v27 = vld [vmem:[#allocation2 + $0x120] ss:$8 sps:$4 sm:$0xff]   ;;  %v1516_v29 = vld [vmem:[#allocation2 + $0x134] ss:$8 sps:$4 sm:$0xff]   ;;  %v1511_v31 = vld [vmem:[#allocation2 + $0x30] ss:$8 sps:$4 sm:$0xff]   ;;  %v57_v33 = vpack.c.bf16 %v52_v30, %v51_v25 }
  0x1c   :  { %1271 = vmatmul.mubr.msk.bf16.vlgmr.msra.gmra.mrb[0].mxu0 %vm129_vm0, %v55_v11  ;;  %1275 = vmatmul.mubr.msk.bf16.vlgmr.msra.gmra.mrb[0].mxu1 %vm129_vm0, %v55_v11  ;;  %v1514_v32 = vld [vmem:[#allocation2 + $0x130] ss:$8 sps:$4 sm:$0xff]   ;;  %v1519_v34 = vld [vmem:[#allocation2 + $0x44] ss:$8 sps:$4 sm:$0xff]   ;;  %v1517_v37 = vld [vmem:[#allocation2 + $0x40] ss:$8 sps:$4 sm:$0xff]  }
  0x1d   :  { %184 = vmatprep.mubr.bf16.mxu0 %v1640_v0  ;;  %257 = vmatprep.mubr.bf16.mxu1 %v1640_v0  ;;  %v1522_v35 = vld [vmem:[#allocation2 + $0x144] ss:$8 sps:$4 sm:$0xff]   ;;  %v53_v36 = vld [vmem:[%s1949_s0 + $0x30] sm:$0xff]  ;;  %v1520_v38 = vld [vmem:[#allocation2 + $0x140] ss:$8 sps:$4 sm:$0xff]  }
  0x1e   :  { %733 = vmatpush1.bf16.msra.mxu1 %v1493_v12  ;;  %806 = vmatpush1.bf16.msra.mxu0 %v1496_v14  ;;  %v1525_v39 = vld [vmem:[#allocation2 + $0x54] ss:$8 sps:$4 sm:$0xff]   ;;  %v1523_v42 = vld [vmem:[#allocation2 + $0x50] ss:$8 sps:$4 sm:$0xff]   ;;  %v1531_v45 = vld [vmem:[#allocation2 + $0x64] ss:$8 sps:$4 sm:$0xff]  }
  0x1f   :  { %734 = vmatprep.subr.bf16.mxu1 %v1501_v17  ;;  %807 = vmatprep.subr.bf16.mxu0 %v1504_v19  ;;  %v1528_v40 = vld [vmem:[#allocation2 + $0x154] ss:$8 sps:$4 sm:$0xff]   ;;  %v1526_v43 = vld [vmem:[#allocation2 + $0x150] ss:$8 sps:$4 sm:$0xff]   ;;  %v1534_v46 = vld [vmem:[#allocation2 + $0x164] ss:$8 sps:$4 sm:$0xff]  }
  0x20   :  { %v54_v41 = vld [vmem:[%s1949_s0 + $0x38] sm:$0xff]  ;;  %v1529_v47 = vld [vmem:[#allocation2 + $0x60] ss:$8 sps:$4 sm:$0xff]   ;;  %v1543_v53 = vld [vmem:[#allocation2 + $0x84] ss:$8 sps:$4 sm:$0xff]  }
  0x21   :  { %v58_v44 = vpack.c.bf16 %v54_v41, %v53_v36  ;;  %v1532_v48 = vld [vmem:[#allocation2 + $0x160] ss:$8 sps:$4 sm:$0xff]   ;;  %v1537_v49 = vld [vmem:[#allocation2 + $0x74] ss:$8 sps:$4 sm:$0xff]   ;;  %v1535_v51 = vld [vmem:[#allocation2 + $0x70] ss:$8 sps:$4 sm:$0xff]  }
  0x22   :  { %735 = vmatpush1.bf16.msra.mxu1 %v1499_v20  ;;  %808 = vmatpush1.bf16.msra.mxu0 %v1502_v21  ;;  %v1540_v50 = vld [vmem:[#allocation2 + $0x174] ss:$8 sps:$4 sm:$0xff]   ;;  %v1538_v52 = vld [vmem:[#allocation2 + $0x170] ss:$8 sps:$4 sm:$0xff]   ;;  %v1546_v54 = vld [vmem:[#allocation2 + $0x184] ss:$8 sps:$4 sm:$0xff]  }
  0x23   :  { %736 = vmatprep.subr.bf16.mxu1 %v1507_v23  ;;  %809 = vmatprep.subr.bf16.mxu0 %v1510_v24  ;;  %v1541_v55 = vld [vmem:[#allocation2 + $0x80] ss:$8 sps:$4 sm:$0xff]   ;;  %v1549_v57 = vld [vmem:[#allocation2 + $0x94] ss:$8 sps:$4 sm:$0xff]   ;;  %v1547_v59 = vld [vmem:[#allocation2 + $0x90] ss:$8 sps:$4 sm:$0xff]  }
  0x24   :  { %1272 = vmatmul.mubr.msk.bf16.gmra.mrb[4].mxu0 %vm129_vm0, %v56_v22  ;;  %1276 = vmatmul.mubr.msk.bf16.gmra.mrb[4].mxu1 %vm129_vm0, %v56_v22  ;;  %v1544_v56 = vld [vmem:[#allocation2 + $0x180] ss:$8 sps:$4 sm:$0xff]   ;;  %v1552_v58 = vld [vmem:[#allocation2 + $0x194] ss:$8 sps:$4 sm:$0xff]   ;;  %v1550_v60 = vld [vmem:[#allocation2 + $0x190] ss:$8 sps:$4 sm:$0xff]   ;;  %v69_v22 = vlaneseq }
  0x25   :  { %194 = vmatprep.mubr.bf16.mxu0 %v1640_v0  ;;  %267 = vmatprep.mubr.bf16.mxu1 %v1640_v0  ;;  %v1555_v61 = vld [vmem:[#allocation2 + $0xa4] ss:$8 sps:$4 sm:$0xff]   ;;  %v1553_v63 = vld [vmem:[#allocation2 + $0xa0] ss:$8 sps:$4 sm:$0xff]   ;;  %v1561_v1 = vld [vmem:[#allocation2 + $0xb4] ss:$8 sps:$4 sm:$0xff]  }
  0x26   :  { %737 = vmatpush1.bf16.msra.mxu1 %v1505_v26  ;;  %810 = vmatpush1.bf16.msra.mxu0 %v1508_v27  ;;  %v1558_v62 = vld [vmem:[#allocation2 + $0x1a4] ss:$8 sps:$4 sm:$0xff]   ;;  %v1564_v2 = vld [vmem:[#allocation2 + $0x1b4] ss:$8 sps:$4 sm:$0xff]   ;;  %v1559_v3 = vld [vmem:[#allocation2 + $0xb0] ss:$8 sps:$4 sm:$0xff]  }
  0x27   :  { %738 = vmatprep.subr.bf16.mxu1 %v1513_v28  ;;  %811 = vmatprep.subr.bf16.mxu0 %v1516_v29  ;;  %v1562_v4 = vld [vmem:[#allocation2 + $0x1b0] ss:$8 sps:$4 sm:$0xff]   ;;  %v1567_v5 = vld [vmem:[#allocation2 + $0xc4] ss:$8 sps:$4 sm:$0xff]   ;;  %v1565_v7 = vld [vmem:[#allocation2 + $0xc0] ss:$8 sps:$4 sm:$0xff]  }
  0x28   :  { %v1570_v6 = vld [vmem:[#allocation2 + $0x1c4] ss:$8 sps:$4 sm:$0xff]   ;;  %v1568_v8 = vld [vmem:[#allocation2 + $0x1c0] ss:$8 sps:$4 sm:$0xff]   ;;  %v1573_v9 = vld [vmem:[#allocation2 + $0xd4] ss:$8 sps:$4 sm:$0xff]  }
  0x29   :  { %v1576_v10 = vld [vmem:[#allocation2 + $0x1d4] ss:$8 sps:$4 sm:$0xff]   ;;  %v1571_v11 = vld [vmem:[#allocation2 + $0xd0] ss:$8 sps:$4 sm:$0xff]   ;;  %v1579_v13 = vld [vmem:[#allocation2 + $0xe4] ss:$8 sps:$4 sm:$0xff]  }
  0x2a   :  { %739 = vmatpush1.bf16.msra.mxu1 %v1511_v31  ;;  %812 = vmatpush1.bf16.msra.mxu0 %v1514_v32  ;;  %v1574_v12 = vld [vmem:[#allocation2 + $0x1d0] ss:$8 sps:$4 sm:$0xff]   ;;  %v1582_v14 = vld [vmem:[#allocation2 + $0x1e4] ss:$8 sps:$4 sm:$0xff]   ;;  %v1577_v15 = vld [vmem:[#allocation2 + $0xe0] ss:$8 sps:$4 sm:$0xff]  }
  0x2b   :  { %740 = vmatprep.subr.bf16.mxu1 %v1519_v34  ;;  %813 = vmatprep.subr.bf16.mxu0 %v1522_v35  ;;  %v1580_v16 = vld [vmem:[#allocation2 + $0x1e0] ss:$8 sps:$4 sm:$0xff]   ;;  %v1585_v17 = vld [vmem:[#allocation2 + $0xf4] ss:$8 sps:$4 sm:$0xff]   ;;  %v1583_v19 = vld [vmem:[#allocation2 + $0xf0] ss:$8 sps:$4 sm:$0xff]  }
  0x2c   :  { %1273 = vmatmul.mubr.msk.bf16.gmra.mrb[8].mxu0 %vm129_vm0, %v57_v33  ;;  %1277 = vmatmul.mubr.msk.bf16.gmra.mrb[8].mxu1 %vm129_vm0, %v57_v33  ;;  %v1588_v18 = vld [vmem:[#allocation2 + $0x1f4] ss:$8 sps:$4 sm:$0xff]   ;;  %v1586_v20 = vld [vmem:[#allocation2 + $0x1f0] ss:$8 sps:$4 sm:$0xff]   ;;  %v1589_v21 = vld [vmem:[%s1954_s5 + $0x40] sm:$0xff]   ;;  %v1770_v23 = vshrl.u32 %v69_v22, 7 }
  0x2d   :  { %204 = vmatprep.mubr.bf16.mxu0 %v1640_v0  ;;  %277 = vmatprep.mubr.bf16.mxu1 %v1640_v0  ;;  %v1556_v0 = vld [vmem:[#allocation2 + $0x1a0] ss:$8 sps:$4 sm:$0xff]  }
  0x2e   :  { %741 = vmatpush1.bf16.msra.mxu1 %v1517_v37  ;;  %814 = vmatpush1.bf16.msra.mxu0 %v1520_v38  ;;  %v71_v24 = vsub.s32 0, %v1770_v23  ;;  %v79_v25 = vsub.s32 2, %v1770_v23  ;;  %v67_v26 = vld [vmem:[%s1951_s2] sm:$0xf]  ;;  %v75_v27 = vsub.s32 1, %v1770_v23  ;;  %v83_v28 = vsub.s32 3, %v1770_v23 }
  0x2f   :  { %742 = vmatprep.subr.bf16.mxu1 %v1525_v39  ;;  %815 = vmatprep.subr.bf16.mxu0 %v1528_v40 }
  0x30   :  { %v1781_v29 = vrot.slane %v67_v26, %v71_v24  ;;  %v1783_v30 = vrot.slane %v67_v26, %v79_v25  ;;  %v1787_v31 = vrot.slane %v67_v26, %v75_v27  ;;  %v1789_v32 = vrot.slane %v67_v26, %v83_v28 }
  0x32   :  { %743 = vmatpush1.bf16.msra.mxu1 %v1523_v42  ;;  %816 = vmatpush1.bf16.msra.mxu0 %v1526_v43 }
  0x33   :  { %744 = vmatprep.subr.bf16.mxu1 %v1531_v45  ;;  %817 = vmatprep.subr.bf16.mxu0 %v1534_v46 }
  0x34   :  { %1274 = vmatmul.mubr.msk.bf16.gmra.mrb[12].mxu0 %vm129_vm0, %v58_v44  ;;  %1278 = vmatmul.mubr.msk.bf16.gmra.mrb[12].mxu1 %vm129_vm0, %v58_v44 }
  0x36   :  { %745 = vmatpush1.bf16.msra.mxu1 %v1529_v47  ;;  %818 = vmatpush1.bf16.msra.mxu0 %v1532_v48 }
  0x37   :  { %746 = vmatprep.subr.bf16.mxu1 %v1537_v49  ;;  %819 = vmatprep.subr.bf16.mxu0 %v1540_v50 }
  0x3a   :  { %747 = vmatpush1.bf16.msra.mxu1 %v1535_v51  ;;  %820 = vmatpush1.bf16.msra.mxu0 %v1538_v52 }
  0x3b   :  { %748 = vmatprep.subr.bf16.mxu1 %v1543_v53  ;;  %821 = vmatprep.subr.bf16.mxu0 %v1546_v54 }
  0x3e   :  { %749 = vmatpush1.bf16.msra.mxu1 %v1541_v55  ;;  %822 = vmatpush1.bf16.msra.mxu0 %v1544_v56 }
  0x3f   :  { %750 = vmatprep.subr.bf16.mxu1 %v1549_v57  ;;  %823 = vmatprep.subr.bf16.mxu0 %v1552_v58 }
  0x42   :  { %751 = vmatpush1.bf16.msra.mxu1 %v1547_v59  ;;  %824 = vmatpush1.bf16.msra.mxu0 %v1550_v60 }
  0x43   :  { %752 = vmatprep.subr.bf16.mxu1 %v1555_v61  ;;  %825 = vmatprep.subr.bf16.mxu0 %v1558_v62 }
  0x46   :  { %753 = vmatpush1.bf16.msra.mxu1 %v1553_v63  ;;  %826 = vmatpush1.bf16.msra.mxu0 %v1556_v0  ;;  %v1590_v63 = vld [vmem:[%s1954_s5] sm:$0xff]  }
  0x47   :  { %754 = vmatprep.subr.bf16.mxu1 %v1561_v1  ;;  %827 = vmatprep.subr.bf16.mxu0 %v1564_v2 }
  0x4a   :  { %755 = vmatpush1.bf16.msra.mxu1 %v1559_v3  ;;  %828 = vmatpush1.bf16.msra.mxu0 %v1562_v4  ;;  %v1591_v4 = vld [vmem:[%s1954_s5 + $0x48] sm:$0xff]  }
  0x4b   :  { %756 = vmatprep.subr.bf16.mxu1 %v1567_v5  ;;  %829 = vmatprep.subr.bf16.mxu0 %v1570_v6 }
  0x4e   :  { %757 = vmatpush1.bf16.msra.mxu1 %v1565_v7  ;;  %830 = vmatpush1.bf16.msra.mxu0 %v1568_v8 }
  0x4f   :  { %758 = vmatprep.subr.bf16.mxu1 %v1573_v9  ;;  %831 = vmatprep.subr.bf16.mxu0 %v1576_v10 }
  0x52   :  { %759 = vmatpush1.bf16.msra.mxu1 %v1571_v11  ;;  %832 = vmatpush1.bf16.msra.mxu0 %v1574_v12 }
  0x53   :  { %760 = vmatprep.subr.bf16.mxu1 %v1579_v13  ;;  %833 = vmatprep.subr.bf16.mxu0 %v1582_v14 }
  0x56   :  { %761 = vmatpush1.bf16.msra.mxu1 %v1577_v15  ;;  %834 = vmatpush1.bf16.msra.mxu0 %v1580_v16 }
  0x57   :  { %762 = vmatprep.subr.bf16.mxu1 %v1585_v17  ;;  %835 = vmatprep.subr.bf16.mxu0 %v1588_v18  ;;  %v1592_v17 = vld [vmem:[%s1954_s5 + $0x8] sm:$0xff]  }
  0x5a   :  { %763 = vmatpush1.bf16.msra.mxu1 %v1583_v19  ;;  %836 = vmatpush1.bf16.msra.mxu0 %v1586_v20 }
  0x5b   :  { %1369 = vmatprep.subr.bf16.mxu0 %v1589_v21  ;;  %v1593_v21 = vld [vmem:[%s1954_s5 + $0x50] sm:$0xff]  }
  0xef   :  { %v176_v33 = vpop.f32.mrb[0].mxu0  ;;  %v249_v34 = vpop.f32.mrb[0].mxu1 }
  0xf0   :  { %v177_v35 = vadd.f32 %v176_v33, %v1781_v29  ;;  %v250_v36 = vadd.f32 %v249_v34, %v1783_v30  ;;  %v178_v37 = vpop.f32.mrb[1].mxu0  ;;  %v251_v38 = vpop.f32.mrb[1].mxu1 }
  0xf1   :  { %v179_v39 = vadd.f32 %v178_v37, %v1787_v31  ;;  %v252_v40 = vadd.f32 %v251_v38, %v1789_v32  ;;  %v180_v41 = vpop.f32.mrb[2].mxu0  ;;  %v253_v42 = vpop.f32.mrb[2].mxu1  ;;  %v1594_v38 = vld [vmem:[%s1954_s5 + $0x10] sm:$0xff]  }
  0xf2   :  { %v290_v43 = vmax.f32 %v250_v36, 0.0  ;;  %v181_v44 = vadd.f32 %v180_v41, %v1781_v29  ;;  %v254_v45 = vadd.f32 %v253_v42, %v1783_v30  ;;  %v182_v46 = vpop.f32.mrb[3].mxu0  ;;  %v255_v47 = vpop.f32.mrb[3].mxu1  ;;  %v288_v51 = vmax.f32 %v177_v35, 0.0 }
  0xf3   :  { %v291_v48 = vmax.f32 %v252_v40, 0.0  ;;  %v183_v49 = vadd.f32 %v182_v46, %v1787_v31  ;;  %v256_v50 = vadd.f32 %v255_v47, %v1789_v32  ;;  %v289_v54 = vmax.f32 %v179_v39, 0.0 }
  0xf4   :  { %v292_v52 = vmax.f32 %v181_v44, 0.0  ;;  %v294_v53 = vmax.f32 %v254_v45, 0.0 }
  0xf5   :  { %v293_v55 = vmax.f32 %v183_v49, 0.0  ;;  %v295_v56 = vmax.f32 %v256_v50, 0.0 }
  0xf6   :  { %v320_v57 = vpack.c.bf16 %v292_v52, %v288_v51  ;;  %v322_v58 = vpack.c.bf16 %v294_v53, %v290_v43  ;;  %v1595_v43 = vld [vmem:[%s1954_s5 + $0x58] sm:$0xff]  }
  0xf7   :  { %v321_v59 = vpack.c.bf16 %v293_v55, %v289_v54  ;;  %v323_v60 = vpack.c.bf16 %v295_v56, %v291_v48  ;;  %v186_v61 = vpop.f32.mrb[4].mxu0  ;;  %v259_v62 = vpop.f32.mrb[4].mxu1  ;;  %v1596_v56 = vld [vmem:[%s1954_s5 + $0x18] sm:$0xff]  }
  0xf8   :  { %v187_v0 = vadd.f32 %v186_v61, %v1781_v29  ;;  %v260_v1 = vadd.f32 %v259_v62, %v1783_v30  ;;  %v188_v2 = vpop.f32.mrb[5].mxu0  ;;  %v261_v3 = vpop.f32.mrb[5].mxu1 }
  0xf9   :  { %v189_v5 = vadd.f32 %v188_v2, %v1787_v31  ;;  %v262_v6 = vadd.f32 %v261_v3, %v1789_v32  ;;  %v190_v7 = vpop.f32.mrb[6].mxu0  ;;  %v263_v8 = vpop.f32.mrb[6].mxu1  ;;  %764 = vmatprep.mubr.bf16.mxu1 %v321_v59  ;;  %837 = vmatprep.mubr.bf16.mxu0 %v323_v60  ;;  %v1597_v60 = vld [vmem:[%s1954_s5 + $0x60] sm:$0xff]  }
  0xfa   :  { %v298_v9 = vmax.f32 %v260_v1, 0.0  ;;  %v191_v10 = vadd.f32 %v190_v7, %v1781_v29  ;;  %v264_v11 = vadd.f32 %v263_v8, %v1783_v30  ;;  %v192_v12 = vpop.f32.mrb[7].mxu0  ;;  %v265_v13 = vpop.f32.mrb[7].mxu1  ;;  %765 = vmatmul.mubr.bf16.vlgmr.msra.gmra.mrb[16].mxu1 %v320_v57  ;;  %838 = vmatmul.mubr.bf16.vlgmr.msra.gmra.mrb[16].mxu0 %v322_v58  ;;  %v296_v18 = vmax.f32 %v187_v0, 0.0 }
  0xfb   :  { %v299_v14 = vmax.f32 %v262_v6, 0.0  ;;  %v193_v15 = vadd.f32 %v192_v12, %v1787_v31  ;;  %v266_v16 = vadd.f32 %v265_v13, %v1789_v32  ;;  %1370 = vmatpush3.bf16.msra.mxu0 %v1590_v63  ;;  %v297_v22 = vmax.f32 %v189_v5, 0.0  ;;  %v1598_v6 = vld [vmem:[%s1954_s5 + $0x20] sm:$0xff]  }
  0xfc   :  { %v300_v19 = vmax.f32 %v191_v10, 0.0  ;;  %v302_v20 = vmax.f32 %v264_v11, 0.0  ;;  %1371 = vmatprep.subr.bf16.mxu0 %v1591_v4 }
  0xfd   :  { %v301_v25 = vmax.f32 %v193_v15, 0.0  ;;  %v303_v26 = vmax.f32 %v266_v16, 0.0 }
  0xfe   :  { %v324_v28 = vpack.c.bf16 %v300_v19, %v296_v18  ;;  %v326_v33 = vpack.c.bf16 %v302_v20, %v298_v9 }
  0xff   :  { %v325_v34 = vpack.c.bf16 %v301_v25, %v297_v22  ;;  %v327_v35 = vpack.c.bf16 %v303_v26, %v299_v14  ;;  %v196_v36 = vpop.f32.mrb[8].mxu0  ;;  %v269_v37 = vpop.f32.mrb[8].mxu1  ;;  %1372 = vmatpush3.bf16.msra.mxu0 %v1592_v17 }
 0x100   :  { %v197_v39 = vadd.f32 %v196_v36, %v1781_v29  ;;  %v270_v40 = vadd.f32 %v269_v37, %v1783_v30  ;;  %v198_v41 = vpop.f32.mrb[9].mxu0  ;;  %v271_v42 = vpop.f32.mrb[9].mxu1  ;;  %1373 = vmatprep.subr.bf16.mxu0 %v1593_v21 }
 0x101   :  { %v199_v44 = vadd.f32 %v198_v41, %v1787_v31  ;;  %v272_v45 = vadd.f32 %v271_v42, %v1789_v32  ;;  %v200_v46 = vpop.f32.mrb[10].mxu0  ;;  %v273_v47 = vpop.f32.mrb[10].mxu1  ;;  %774 = vmatprep.mubr.bf16.mxu1 %v325_v34  ;;  %847 = vmatprep.mubr.bf16.mxu0 %v327_v35  ;;  %v1604_v41 = vld [vmem:[%s1954_s5 + $0x38] sm:$0xff]   ;;  %v1605_v42 = vld [vmem:[%s1956_s7] sm:$0xff]  }
 0x102   :  { %v306_v48 = vmax.f32 %v270_v40, 0.0  ;;  %v201_v49 = vadd.f32 %v200_v46, %v1781_v29  ;;  %v274_v50 = vadd.f32 %v273_v47, %v1783_v30  ;;  %v202_v51 = vpop.f32.mrb[11].mxu0  ;;  %v275_v52 = vpop.f32.mrb[11].mxu1  ;;  %775 = vmatmul.mubr.bf16.gmra.mrb[20].mxu1 %v324_v28  ;;  %848 = vmatmul.mubr.bf16.gmra.mrb[20].mxu0 %v326_v33  ;;  %v304_v57 = vmax.f32 %v197_v39, 0.0  ;;  %v1602_v39 = vld [vmem:[%s1954_s5 + $0x30] sm:$0xff]   ;;  %v1603_v40 = vld [vmem:[%s1954_s5 + $0x78] sm:$0xff]  }
 0x103   :  { %v307_v53 = vmax.f32 %v272_v45, 0.0  ;;  %v203_v54 = vadd.f32 %v202_v51, %v1787_v31  ;;  %v276_v55 = vadd.f32 %v275_v52, %v1789_v32  ;;  %1374 = vmatpush3.bf16.msra.mxu0 %v1594_v38  ;;  %v305_v61 = vmax.f32 %v199_v44, 0.0  ;;  %v1601_v38 = vld [vmem:[%s1954_s5 + $0x70] sm:$0xff]   ;;  %1421 = vmatprep.subr.bf16.mxu1 %v1605_v42  ;;  %v400_v45 = vld [vmem:[%s1953_s4] sm:$0x3] }
 0x104   :  { %v308_v58 = vmax.f32 %v201_v49, 0.0  ;;  %v310_v59 = vmax.f32 %v274_v50, 0.0  ;;  %1375 = vmatprep.subr.bf16.mxu0 %v1595_v43  ;;  %v1606_v43 = vld [vmem:[%s1956_s7 + $0x8] sm:$0xff]   ;;  %1422 = vmatpush3.bf16.msra.mxu1 %v1605_v42  ;;  %v1607_v44 = vld [vmem:[%s1956_s7 + $0x10] sm:$0xff]   ;;  %v1882_v46 = vrot.slane %v400_v45, %v71_v24  ;;  %v1886_v47 = vrot.slane %v400_v45, %v75_v27 }
 0x105   :  { %v309_v62 = vmax.f32 %v203_v54, 0.0  ;;  %v311_v63 = vmax.f32 %v276_v55, 0.0  ;;  %1423 = vmatprep.subr.bf16.mxu1 %v1606_v43 }
 0x106   :  { %v328_v0 = vpack.c.bf16 %v308_v58, %v304_v57  ;;  %v330_v1 = vpack.c.bf16 %v310_v59, %v306_v48 }
 0x107   :  { %v329_v2 = vpack.c.bf16 %v309_v62, %v305_v61  ;;  %v331_v3 = vpack.c.bf16 %v311_v63, %v307_v53  ;;  %v206_v4 = vpop.f32.mrb[12].mxu0  ;;  %v279_v5 = vpop.f32.mrb[12].mxu1  ;;  %1376 = vmatpush3.bf16.msra.mxu0 %v1596_v56 }
 0x108   :  { %v207_v7 = vadd.f32 %v206_v4, %v1781_v29  ;;  %v280_v8 = vadd.f32 %v279_v5, %v1783_v30  ;;  %v208_v9 = vpop.f32.mrb[13].mxu0  ;;  %v281_v10 = vpop.f32.mrb[13].mxu1  ;;  %1377 = vmatprep.subr.bf16.mxu0 %v1597_v60  ;;  %1424 = vmatpush3.bf16.msra.mxu1 %v1606_v43 }
 0x109   :  { %v209_v11 = vadd.f32 %v208_v9, %v1787_v31  ;;  %v282_v12 = vadd.f32 %v281_v10, %v1789_v32  ;;  %v210_v13 = vpop.f32.mrb[14].mxu0  ;;  %v283_v14 = vpop.f32.mrb[14].mxu1  ;;  %784 = vmatprep.mubr.bf16.mxu1 %v329_v2  ;;  %857 = vmatprep.mubr.bf16.mxu0 %v331_v3 }
 0x10a   :  { %v314_v15 = vmax.f32 %v280_v8, 0.0  ;;  %v211_v16 = vadd.f32 %v210_v13, %v1781_v29  ;;  %v284_v17 = vadd.f32 %v283_v14, %v1783_v30  ;;  %v212_v18 = vpop.f32.mrb[15].mxu0  ;;  %v285_v19 = vpop.f32.mrb[15].mxu1  ;;  %785 = vmatmul.mubr.bf16.gmra.mrb[24].mxu1 %v328_v0  ;;  %858 = vmatmul.mubr.bf16.gmra.mrb[24].mxu0 %v330_v1  ;;  %v312_v25 = vmax.f32 %v207_v7, 0.0 }
 0x10b   :  { %v315_v20 = vmax.f32 %v282_v12, 0.0  ;;  %v213_v21 = vadd.f32 %v212_v18, %v1787_v31  ;;  %v286_v22 = vadd.f32 %v285_v19, %v1789_v32  ;;  %1378 = vmatpush3.bf16.msra.mxu0 %v1598_v6  ;;  %v313_v33 = vmax.f32 %v209_v11, 0.0  ;;  %v1599_v31 = vld [vmem:[%s1954_s5 + $0x68] sm:$0xff]   ;;  %1425 = vmatprep.subr.bf16.mxu1 %v1607_v44 }
 0x10c   :  { %v316_v26 = vmax.f32 %v211_v16, 0.0  ;;  %v318_v28 = vmax.f32 %v284_v17, 0.0  ;;  %v1600_v32 = vld [vmem:[%s1954_s5 + $0x28] sm:$0xff]   ;;  %1379 = vmatprep.subr.bf16.mxu0 %v1599_v31  ;;  %1426 = vmatpush3.bf16.msra.mxu1 %v1607_v44 }
 0x10d   :  { %v317_v34 = vmax.f32 %v213_v21, 0.0  ;;  %v319_v35 = vmax.f32 %v286_v22, 0.0 }
 0x10e   :  { %v332_v36 = vpack.c.bf16 %v316_v26, %v312_v25  ;;  %v334_v29 = vpack.c.bf16 %v318_v28, %v314_v15 }
 0x10f   :  { %v333_v37 = vpack.c.bf16 %v317_v34, %v313_v33  ;;  %v335_v30 = vpack.c.bf16 %v319_v35, %v315_v20  ;;  %1380 = vmatpush3.bf16.msra.mxu0 %v1600_v32 }
 0x110   :  { %1381 = vmatprep.subr.bf16.mxu0 %v1601_v38 }
 0x111   :  { %794 = vmatprep.mubr.bf16.mxu1 %v333_v37  ;;  %867 = vmatprep.mubr.bf16.mxu0 %v335_v30 }
 0x112   :  { %795 = vmatmul.mubr.bf16.gmra.mrb[28].mxu1 %v332_v36  ;;  %868 = vmatmul.mubr.bf16.gmra.mrb[28].mxu0 %v334_v29 }
 0x113   :  { %1382 = vmatpush3.bf16.msra.mxu0 %v1602_v39 }
 0x114   :  { %1383 = vmatprep.subr.bf16.mxu0 %v1603_v40 }
 0x117   :  { %1384 = vmatpush3.bf16.msra.mxu0 %v1604_v41 }
 0x1cd   :  { %v766_v48 = vpop.f32.mrb[16].mxu1  ;;  %v839_v49 = vpop.f32.mrb[16].mxu0 }
 0x1ce   :  { %v767_v50 = vadd.f32 %v766_v48, %v1882_v46  ;;  %v768_v51 = vpop.f32.mrb[17].mxu1  ;;  %v841_v52 = vpop.f32.mrb[17].mxu0 }
 0x1cf   :  { %v769_v53 = vadd.f32 %v768_v51, %v1886_v47  ;;  %v770_v54 = vpop.f32.mrb[18].mxu1  ;;  %v843_v55 = vpop.f32.mrb[18].mxu0 }
 0x1d0   :  { %v840_v56 = vadd.f32 %v839_v49, %v767_v50  ;;  %v771_v57 = vadd.f32 %v770_v54, %v1882_v46  ;;  %v772_v58 = vpop.f32.mrb[19].mxu1  ;;  %v845_v24 = vpop.f32.mrb[19].mxu0 }
 0x1d1   :  { %v842_v59 = vadd.f32 %v841_v52, %v769_v53  ;;  %v773_v23 = vadd.f32 %v772_v58, %v1886_v47 }
 0x1d2   :  { %v844_v27 = vadd.f32 %v843_v55, %v771_v57  ;;  %v878_v61 = vmax.f32 %v840_v56, 0.0 }
 0x1d3   :  { %v846_v60 = vadd.f32 %v845_v24, %v773_v23  ;;  %v879_v63 = vmax.f32 %v842_v59, 0.0 }
 0x1d4   :  { %v880_v62 = vmax.f32 %v844_v27, 0.0 }
 0x1d5   :  { %v881_v0 = vmax.f32 %v846_v60, 0.0  ;;  %v776_v1 = vpop.f32.mrb[20].mxu1  ;;  %v849_v2 = vpop.f32.mrb[20].mxu0 }
 0x1d6   :  { %v894_v3 = vpack.c.bf16 %v880_v62, %v878_v61  ;;  %v777_v4 = vadd.f32 %v776_v1, %v1882_v46  ;;  %v778_v5 = vpop.f32.mrb[21].mxu1  ;;  %v851_v6 = vpop.f32.mrb[21].mxu0 }
 0x1d7   :  { %v895_v7 = vpack.c.bf16 %v881_v0, %v879_v63  ;;  %v779_v8 = vadd.f32 %v778_v5, %v1886_v47  ;;  %v780_v9 = vpop.f32.mrb[22].mxu1  ;;  %v853_v10 = vpop.f32.mrb[22].mxu0 }
 0x1d8   :  { %v850_v11 = vadd.f32 %v849_v2, %v777_v4  ;;  %v781_v12 = vadd.f32 %v780_v9, %v1882_v46  ;;  %v782_v13 = vpop.f32.mrb[23].mxu1  ;;  %v855_v14 = vpop.f32.mrb[23].mxu0  ;;  %v1612_v9 = vld [vmem:[%s1956_s7 + $0x38] sm:$0xff]  }
 0x1d9   :  { %v852_v15 = vadd.f32 %v851_v6, %v779_v8  ;;  %v783_v16 = vadd.f32 %v782_v13, %v1886_v47  ;;  %1069 = vmatprep.mubr.bf16.mxu0 %v895_v7  ;;  %v1610_v7 = vld [vmem:[%s1956_s7 + $0x28] sm:$0xff]   ;;  %v1611_v8 = vld [vmem:[%s1956_s7 + $0x30] sm:$0xff]  }
 0x1da   :  { %v854_v17 = vadd.f32 %v853_v10, %v781_v12  ;;  %1070 = vmatmul.mubr.bf16.vlgmr.msra.gmra.mrb[32].mxu0 %v894_v3  ;;  %v882_v19 = vmax.f32 %v850_v11, 0.0  ;;  %v1343_v11 = vld [vmem:[%s1955_s6] ss:$0 sm:$0xff] }
 0x1db   :  { %v856_v18 = vadd.f32 %v855_v14, %v783_v16  ;;  %v883_v21 = vmax.f32 %v852_v15, 0.0 }
 0x1dc   :  { %v884_v20 = vmax.f32 %v854_v17, 0.0 }
 0x1dd   :  { %v885_v22 = vmax.f32 %v856_v18, 0.0  ;;  %v786_v25 = vpop.f32.mrb[24].mxu1  ;;  %v859_v26 = vpop.f32.mrb[24].mxu0 }
 0x1de   :  { %v896_v28 = vpack.c.bf16 %v884_v20, %v882_v19  ;;  %v787_v33 = vadd.f32 %v786_v25, %v1882_v46  ;;  %v788_v34 = vpop.f32.mrb[25].mxu1  ;;  %v861_v35 = vpop.f32.mrb[25].mxu0 }
 0x1df   :  { %v897_v36 = vpack.c.bf16 %v885_v22, %v883_v21  ;;  %v789_v29 = vadd.f32 %v788_v34, %v1886_v47  ;;  %v790_v37 = vpop.f32.mrb[26].mxu1  ;;  %v863_v30 = vpop.f32.mrb[26].mxu0 }
 0x1e0   :  { %v860_v31 = vadd.f32 %v859_v26, %v787_v33  ;;  %v791_v32 = vadd.f32 %v790_v37, %v1882_v46  ;;  %v792_v38 = vpop.f32.mrb[27].mxu1  ;;  %v865_v39 = vpop.f32.mrb[27].mxu0 }
 0x1e1   :  { %v862_v40 = vadd.f32 %v861_v35, %v789_v29  ;;  %v793_v41 = vadd.f32 %v792_v38, %v1886_v47  ;;  %1077 = vmatprep.mubr.bf16.mxu0 %v897_v36 }
 0x1e2   :  { %v864_v42 = vadd.f32 %v863_v30, %v791_v32  ;;  %1078 = vmatmul.mubr.bf16.gmra.mrb[36].mxu0 %v896_v28  ;;  %v886_v44 = vmax.f32 %v860_v31, 0.0 }
 0x1e3   :  { %v866_v43 = vadd.f32 %v865_v39, %v793_v41  ;;  %v887_v48 = vmax.f32 %v862_v40, 0.0 }
 0x1e4   :  { %v888_v45 = vmax.f32 %v864_v42, 0.0 }
 0x1e5   :  { %v889_v49 = vmax.f32 %v866_v43, 0.0  ;;  %v796_v50 = vpop.f32.mrb[28].mxu1  ;;  %v869_v51 = vpop.f32.mrb[28].mxu0 }
 0x1e6   :  { %v898_v52 = vpack.c.bf16 %v888_v45, %v886_v44  ;;  %v797_v53 = vadd.f32 %v796_v50, %v1882_v46  ;;  %v798_v54 = vpop.f32.mrb[29].mxu1  ;;  %v871_v55 = vpop.f32.mrb[29].mxu0 }
 0x1e7   :  { %v899_v56 = vpack.c.bf16 %v889_v49, %v887_v48  ;;  %v799_v57 = vadd.f32 %v798_v54, %v1886_v47  ;;  %v800_v58 = vpop.f32.mrb[30].mxu1  ;;  %v873_v24 = vpop.f32.mrb[30].mxu0 }
 0x1e8   :  { %v870_v59 = vadd.f32 %v869_v51, %v797_v53  ;;  %v801_v23 = vadd.f32 %v800_v58, %v1882_v46  ;;  %v802_v27 = vpop.f32.mrb[31].mxu1  ;;  %v875_v60 = vpop.f32.mrb[31].mxu0  ;;  %v1608_v46 = vld [vmem:[%s1956_s7 + $0x18] sm:$0xff]  }
 0x1e9   :  { %v872_v61 = vadd.f32 %v871_v55, %v799_v57  ;;  %v803_v62 = vadd.f32 %v802_v27, %v1886_v47  ;;  %1085 = vmatprep.mubr.bf16.mxu0 %v899_v56  ;;  %1427 = vmatprep.subr.bf16.mxu1 %v1608_v46  ;;  %v1609_v47 = vld [vmem:[%s1956_s7 + $0x20] sm:$0xff]  }
 0x1ea   :  { %v874_v63 = vadd.f32 %v873_v24, %v801_v23  ;;  %1086 = vmatmul.mubr.bf16.gmra.mrb[40].mxu0 %v898_v52  ;;  %v890_v1 = vmax.f32 %v870_v59, 0.0  ;;  %1428 = vmatpush3.bf16.msra.mxu1 %v1608_v46  ;;  %v1360_v59 = vld [vmem:[%s1957_s8] ss:$0 sm:$0xff] }
 0x1eb   :  { %v876_v0 = vadd.f32 %v875_v60, %v803_v62  ;;  %v891_v3 = vmax.f32 %v872_v61, 0.0  ;;  %1429 = vmatprep.subr.bf16.mxu1 %v1609_v47 }
 0x1ec   :  { %v892_v2 = vmax.f32 %v874_v63, 0.0 }
 0x1ed   :  { %v893_v4 = vmax.f32 %v876_v0, 0.0 }
 0x1ee   :  { %v900_v5 = vpack.c.bf16 %v892_v2, %v890_v1  ;;  %1430 = vmatpush3.bf16.msra.mxu1 %v1609_v47 }
 0x1ef   :  { %v901_v6 = vpack.c.bf16 %v893_v4, %v891_v3  ;;  %1431 = vmatprep.subr.bf16.mxu1 %v1610_v7 }
 0x1f1   :  { %1093 = vmatprep.mubr.bf16.mxu0 %v901_v6 }
 0x1f2   :  { %1094 = vmatmul.mubr.bf16.gmra.mrb[44].mxu0 %v900_v5  ;;  %1432 = vmatpush3.bf16.msra.mxu1 %v1610_v7 }
 0x1f3   :  { %1433 = vmatprep.subr.bf16.mxu1 %v1611_v8 }
 0x1f6   :  { %1434 = vmatpush3.bf16.msra.mxu1 %v1611_v8 }
 0x1f7   :  { %1435 = vmatprep.subr.bf16.mxu1 %v1612_v9 }
 0x1fa   :  { %1436 = vmatpush3.bf16.msra.mxu1 %v1612_v9 }
 0x2ad   :  { %v1385_v10 = vpop.f32.mrb[32].mxu0 }
 0x2ae   :  { %v1386_v12 = vpop.f32.mrb[33].mxu0 }
 0x2af   :  { %v1387_v13 = vadd.f32 %v1386_v12, %v1385_v10  ;;  %v1388_v14 = vpop.f32.mrb[34].mxu0 }
 0x2b0   :  { %v1389_v15 = vpop.f32.mrb[35].mxu0 }
 0x2b1   :  { %v1072_v16 = vadd.f32 %v1387_v13, %v1343_v11  ;;  %v1390_v17 = vadd.f32 %v1389_v15, %v1388_v14 }
 0x2b3   :  { %v1075_v18 = vadd.f32 %v1390_v17, %v1343_v11  ;;  %v1102_v19 = vmax.f32 %v1072_v16, 0.0 }
 0x2b5   :  { %v1103_v20 = vmax.f32 %v1075_v18, 0.0  ;;  %v1391_v21 = vpop.f32.mrb[36].mxu0 }
 0x2b6   :  { %v1392_v22 = vpop.f32.mrb[37].mxu0 }
 0x2b7   :  { %v1393_v25 = vadd.f32 %v1392_v22, %v1391_v21  ;;  %v1394_v26 = vpop.f32.mrb[38].mxu0  ;;  %v1110_v28 = vpack.c.bf16 %v1103_v20, %v1102_v19 }
 0x2b8   :  { %v1395_v33 = vpop.f32.mrb[39].mxu0 }
 0x2b9   :  { %v1080_v34 = vadd.f32 %v1393_v25, %v1343_v11  ;;  %v1396_v35 = vadd.f32 %v1395_v33, %v1394_v26  ;;  %1437 = vmatprep.mubr.bf16.mxu1 %v1110_v28 }
 0x2bb   :  { %v1083_v36 = vadd.f32 %v1396_v35, %v1343_v11  ;;  %v1104_v29 = vmax.f32 %v1080_v34, 0.0 }
 0x2bd   :  { %v1105_v37 = vmax.f32 %v1083_v36, 0.0  ;;  %v1397_v30 = vpop.f32.mrb[40].mxu0 }
 0x2be   :  { %v1398_v31 = vpop.f32.mrb[41].mxu0 }
 0x2bf   :  { %v1111_v32 = vpack.c.bf16 %v1105_v37, %v1104_v29  ;;  %v1399_v38 = vadd.f32 %v1398_v31, %v1397_v30  ;;  %v1400_v39 = vpop.f32.mrb[42].mxu0 }
 0x2c0   :  { %v1401_v40 = vpop.f32.mrb[43].mxu0 }
 0x2c1   :  { %v1088_v41 = vadd.f32 %v1399_v38, %v1343_v11  ;;  %v1402_v42 = vadd.f32 %v1401_v40, %v1400_v39  ;;  %1438 = vmatmul.mubr.bf16.vlgmr.msra.gmra.mrb[32].mxu1 %v1111_v32 }
 0x2c3   :  { %v1091_v43 = vadd.f32 %v1402_v42, %v1343_v11  ;;  %v1106_v44 = vmax.f32 %v1088_v41, 0.0 }
 0x2c5   :  { %v1107_v45 = vmax.f32 %v1091_v43, 0.0  ;;  %v1403_v48 = vpop.f32.mrb[44].mxu0 }
 0x2c6   :  { %v1404_v49 = vpop.f32.mrb[45].mxu0 }
 0x2c7   :  { %v1405_v50 = vadd.f32 %v1404_v49, %v1403_v48  ;;  %v1406_v51 = vpop.f32.mrb[46].mxu0  ;;  %v1112_v52 = vpack.c.bf16 %v1107_v45, %v1106_v44 }
 0x2c8   :  { %v1407_v53 = vpop.f32.mrb[47].mxu0 }
 0x2c9   :  { %v1096_v54 = vadd.f32 %v1405_v50, %v1343_v11  ;;  %v1408_v55 = vadd.f32 %v1407_v53, %v1406_v51  ;;  %1441 = vmatprep.mubr.bf16.mxu1 %v1112_v52 }
 0x2cb   :  { %v1099_v56 = vadd.f32 %v1408_v55, %v1343_v11  ;;  %v1108_v57 = vmax.f32 %v1096_v54, 0.0 }
 0x2cd   :  { %v1109_v58 = vmax.f32 %v1099_v56, 0.0 }
 0x2cf   :  { %v1113_v24 = vpack.c.bf16 %v1109_v58, %v1108_v57 }
 0x2d1   :  { %1442 = vmatmul.mubr.bf16.gmra.mrb[36].mxu1 %v1113_v24 }
 0x394   :  { %v1439_v23 = vpop.f32.mrb[32].mxu1 }
 0x395   :  { %v1228_v27 = vadd.f32 %v1439_v23, %v1360_v59  ;;  %v1219_v60 = vpop.f32.mrb[33].mxu1 }
 0x396   :  { %v1220_v61 = vadd.f32 %v1360_v59, %v1219_v60  ;;  %v1440_v62 = vpop.f32.mrb[34].mxu1 }
 0x397   :  { %1252 = vst [vmem:[%s1958_s9 + $0x10] sm:$0xff] %v1228_v27  ;;  %v1231_v63 = vadd.f32 %v1440_v62, %v1360_v59  ;;  %v1222_v0 = vpop.f32.mrb[35].mxu1 }
 0x398   :  { %1250 = vst [vmem:[%s1958_s9] sm:$0xff] %v1220_v61  ;;  %v1223_v1 = vadd.f32 %v1360_v59, %v1222_v0 }
 0x399   :  { %1253 = vst [vmem:[%s1958_s9 + $0x18] sm:$0xff] %v1231_v63 }
 0x39a   :  { %1251 = vst [vmem:[%s1958_s9 + $0x8] sm:$0xff] %v1223_v1 }
 0x3a4   :  { %v1443_v2 = vpop.f32.mrb[36].mxu1 }
 0x3a5   :  { %v1244_v3 = vadd.f32 %v1443_v2, %v1360_v59  ;;  %v1235_v4 = vpop.f32.mrb[37].mxu1 }
 0x3a6   :  { %v1236_v5 = vadd.f32 %v1360_v59, %v1235_v4  ;;  %v1444_v6 = vpop.f32.mrb[38].mxu1 }
 0x3a7   :  { %1256 = vst [vmem:[%s1958_s9 + $0x30] sm:$0xff] %v1244_v3  ;;  %v1247_v46 = vadd.f32 %v1444_v6, %v1360_v59  ;;  %v1238_v47 = vpop.f32.mrb[39].mxu1 }
 0x3a8   :  { %1254 = vst [vmem:[%s1958_s9 + $0x20] sm:$0xff] %v1236_v5  ;;  %v1239_v7 = vadd.f32 %v1360_v59, %v1238_v47 }
 0x3a9   :  { %1257 = vst [vmem:[%s1958_s9 + $0x38] sm:$0xff] %v1247_v46 }
 0x3aa   :  { %1255 = vst [vmem:[%s1958_s9 + $0x28] sm:$0xff] %v1239_v7 }
 0x3ab   :  { %1262 = vsyncpa [#allocation3], 1 }

</bundles_post_ra>
